<compile_context>
chip_gen: v5e
topology: v5e:2x2
jax: 0.10.0
libtpu: 0.0.40
codegen_flags: <defaults>
</compile_context>

<pallas_src>
import functools
import inspect

import jax
import jax.numpy as jnp
from jax.experimental import pallas as pl
from jax.experimental.pallas import tpu as pltpu

LN_EPS = 1e-5  # nn.LayerNorm default eps


# --------------------------------------------------------------------------
# Capability probes (never wrap the real kernel's pallas_call).
# --------------------------------------------------------------------------
def _signature_has_pipeline_mode():
    if not hasattr(pl, "Buffered"):
        return False
    try:
        return "pipeline_mode" in inspect.signature(pl.BlockSpec).parameters
    except (TypeError, ValueError):
        return False


@functools.lru_cache(maxsize=1)
def _buffered_ok():
    """End-to-end probe for pipeline_mode=pl.Buffered(1) on a grid-invariant
    input.  Runs a tiny eager kernel once; failure here only disables the
    single-buffering optimization -- it never masks errors of the real kernel."""
    if not _signature_has_pipeline_mode():
        return False
    try:
        def k(a_ref, b_ref, o_ref):
            o_ref[...] = a_ref[...] + b_ref[...]

        a = jnp.zeros((16, 128), jnp.float32)
        b = jnp.zeros((8, 128), jnp.float32)
        out = pl.pallas_call(
            k,
            out_shape=jax.ShapeDtypeStruct((16, 128), jnp.float32),
            grid=(2,),
            in_specs=[
                pl.BlockSpec((8, 128), lambda i: (i, 0)),
                pl.BlockSpec((8, 128), lambda i: (0, 0),
                             pipeline_mode=pl.Buffered(1)),
            ],
            out_specs=pl.BlockSpec((8, 128), lambda i: (i, 0)),
        )(a, b)
        jax.block_until_ready(out)
        return True
    except Exception:   # probe only
        return False


def _vmem_capacity_bytes():
    """Per-core VMEM capacity; probe only (never masks kernel errors)."""
    if hasattr(pltpu, "get_tpu_info"):
        try:
            cap = int(pltpu.get_tpu_info().vmem_capacity_bytes)
            if cap > 0:
                return cap
        except Exception:
            pass
    return 64 * 1024 * 1024  # conservative default = v7x per-TensorCore VMEM


def _const_spec(shape, index_map, single_buffer):
    """BlockSpec for a grid-invariant operand (weights / bias / colsum)."""
    if single_buffer:
        return pl.BlockSpec(shape, index_map, pipeline_mode=pl.Buffered(1))
    return pl.BlockSpec(shape, index_map)


def _choose_row_tile(rows, per_row_bytes, budget_bytes):
    """Largest divisor of `rows` that fits the VMEM budget while keeping >= 4
    grid steps (so input DMAs overlap compute and v7x's two TensorCores each
    get >= 2 steps on the 'parallel' axis); relaxes to >= 2, then >= 1."""
    divisors = set()
    d = 1
    while d * d <= rows:
        if rows % d == 0:
            divisors.add(d)
            divisors.add(rows // d)
        d += 1
    divisors = sorted(divisors, reverse=True)
    for min_steps in (4, 2, 1):
        for tr in divisors:
            if rows // tr >= min_steps and tr * per_row_bytes <= budget_bytes:
                return tr
    return 1


# --------------------------------------------------------------------------
# Kernel
# --------------------------------------------------------------------------
def _patch_merge_kernel(xe_ref, xo_ref, we_ref, wo_ref, cs_ref, b_ref, o_ref,
                        *, feat):
    """One grid step: `tr` merged image rows x `Wh` output tokens.

    xe_ref / xo_ref : (tr, Wh, 2C) even / odd H-parity rows; the last dim is
                      already the lane concat [x0|x2] / [x1|x3].
    we_ref / wo_ref : (2C, N) LN-affine-folded projection halves (bf16).
    cs_ref          : (1, N)  f32 column sums of the full folded (4C, N) weight.
    b_ref           : (1, N)  f32 folded bias (beta @ W.T).
    o_ref           : (tr, Wh, N) output block.
    """
    tr, wh, c2 = xe_ref.shape
    tokens = tr * wh
    n_out = o_ref.shape[-1]

    # Leading-dim merge only (lane dim untouched) -> cheap.
    xe = xe_ref[...].reshape(tokens, c2)
    xo = xo_ref[...].reshape(tokens, c2)

    # One-pass LayerNorm statistics over the 4C features, in f32.
    xef = xe.astype(jnp.float32)
    xof = xo.astype(jnp.float32)
    s1 = (jnp.sum(xef, axis=-1, keepdims=True)
          + jnp.sum(xof, axis=-1, keepdims=True))
    s2 = (jnp.sum(xef * xef, axis=-1, keepdims=True)
          + jnp.sum(xof * xof, axis=-1, keepdims=True))
    inv_k = jnp.float32(1.0 / feat)
    mean = s1 * inv_k
    var = jnp.maximum(s2 * inv_k - mean * mean, 0.0)
    rstd = jax.lax.rsqrt(var + jnp.float32(LN_EPS))

    # Uncentered MXU matmul on the raw tiles (bf16 operands, f32 accumulation);
    # LN centering/scale is applied as a rank-1 / per-row correction on the
    # (tokens, N) result -> no (tokens, 4C) normalized temp, ~2/3 less VPU work.
    cdt = we_ref.dtype
    acc = jnp.dot(xe.astype(cdt), we_ref[...], preferred_element_type=jnp.float32)
    acc = acc + jnp.dot(xo.astype(cdt), wo_ref[...],
                        preferred_element_type=jnp.float32)

    y = rstd * (acc - mean * cs_ref[...]) + b_ref[...]
    o_ref[...] = y.reshape(tr, wh, n_out).astype(o_ref.dtype)


# --------------------------------------------------------------------------
# Wrapper
# --------------------------------------------------------------------------
def patch_merging(x, gamma, beta, weight, input_resolution, *,
                  row_tile=None, compute_dtype=jnp.bfloat16):
    """Swin PatchMerging forward.

    x: (B, H*W, C); gamma/beta: (4C,) LayerNorm affine; weight: (2C, 4C)
    (torch nn.Linear layout, bias-free). Returns (B, (H/2)*(W/2), 2C).
    """
    H, W = input_resolution
    B, L, C = x.shape
    assert L == H * W, "input feature has wrong size"
    assert H % 2 == 0 and W % 2 == 0, f"x size ({H},{W}) not even."
    K = 4 * C
    N = weight.shape[0]
    assert weight.shape == (N, K) and N == 2 * C
    assert gamma.shape == (K,) and beta.shape == (K,)

    Hh, Wh, C2 = H // 2, W // 2, 2 * C
    R = B * Hh                        # grid rows; each row holds Wh tokens
    out_dtype = x.dtype

    # ---- parameter prep (once, outside the kernel) --------------------------
    w_f32 = weight.astype(jnp.float32)                      # (N, K)
    w_fold = gamma.astype(jnp.float32)[:, None] * w_f32.T   # (K, N), gamma folded
    b_fold = (beta.astype(jnp.float32) @ w_f32.T).reshape(1, N)
    # Split W' by H-parity of the gathered features: even rows see [x0|x2]
    # along lanes, odd rows see [x1|x3].
    w_even = jnp.concatenate([w_fold[0:C], w_fold[2 * C:3 * C]], axis=0)
    w_odd = jnp.concatenate([w_fold[C:2 * C], w_fold[3 * C:4 * C]], axis=0)
    w_even = w_even.astype(compute_dtype)
    w_odd = w_odd.astype(compute_dtype)
    # Column sums of the weights actually fed to the MXU (exact mean fold).
    col_sum = (jnp.sum(w_even.astype(jnp.float32), axis=0)
               + jnp.sum(w_odd.astype(jnp.float32), axis=0)).reshape(1, N)

    # ---- fused even/odd gather: free row-major reshape, no HBM intermediate -
    # (B, H*W, C) == (B, H/2, 2, W/2, 2, C) -> (B*H/2, 2, W/2, 2C)
    x6 = x.reshape(R, 2, Wh, C2)

    # ---- VMEM-aware tiling & limit ------------------------------------------
    x_isz = jnp.dtype(x.dtype).itemsize
    o_isz = jnp.dtype(out_dtype).itemsize
    w_isz = jnp.dtype(compute_dtype).itemsize
    per_row = (2 * 2 * Wh * C2 * x_isz    # even+odd input blocks, double-buffered
               + 2 * Wh * N * o_isz       # output block, double-buffered
               + 4 * Wh * C2 * 4          # in-kernel f32 stat temps (estimate)
               + 2 * Wh * N * 4)          # f32 acc + y (estimate)
    const_bytes = 2 * 2 * C2 * N * w_isz + 2 * 2 * N * 4   # weights/bias (<=2 bufs)
    cap = _vmem_capacity_bytes()
    budget = max(min(cap // 2 - const_bytes - (8 << 20), 24 << 20), per_row)
    tr = row_tile if row_tile is not None else _choose_row_tile(R, per_row, budget)
    assert R % tr == 0, (R, tr)
    need = const_bytes + tr * per_row
    vmem_limit = max(need + (8 << 20), 32 << 20)
    vmem_limit = min(vmem_limit, max((cap * 3) // 4, need + (4 << 20)))

    single_buffer = _buffered_ok()

    grid_spec = pltpu.PrefetchScalarGridSpec(
        num_scalar_prefetch=0,
        grid=(R // tr,),
        in_specs=[
            # H-parity 0 rows -> lanes [x0 | x2]
            pl.BlockSpec((tr, None, Wh, C2), lambda i: (i, 0, 0, 0)),
            # H-parity 1 rows -> lanes [x1 | x3]
            pl.BlockSpec((tr, None, Wh, C2), lambda i: (i, 1, 0, 0)),
            _const_spec((C2, N), lambda i: (0, 0), single_buffer),
            _const_spec((C2, N), lambda i: (0, 0), single_buffer),
            _const_spec((1, N), lambda i: (0, 0), single_buffer),
            _const_spec((1, N), lambda i: (0, 0), single_buffer),
        ],
        out_specs=pl.BlockSpec((tr, Wh, N), lambda i: (i, 0, 0)),
    )

    out = pl.pallas_call(
        functools.partial(_patch_merge_kernel, feat=K),
        out_shape=jax.ShapeDtypeStruct((R, Wh, N), out_dtype),
        grid_spec=grid_spec,
        compiler_params=pltpu.CompilerParams(
            dimension_semantics=("parallel",),
            vmem_limit_bytes=int(vmem_limit),
        ),
    )(x6, x6, w_even, w_odd, col_sum, b_fold)

    # (R, Wh, N) == (B, H/2, W/2, N) row-major -> (B, H/2*W/2, 2C); free reshape.
    return out.reshape(B, Hh * Wh, N)


# --------------------------------------------------------------------------
# Pure-JAX reference (f32)
# --------------------------------------------------------------------------
def _reference(x, gamma, beta, weight, input_resolution):
    H, W = input_resolution
    B, L, C = x.shape
    xv = x.reshape(B, H, W, C)
    x0 = xv[:, 0::2, 0::2, :]
    x1 = xv[:, 1::2, 0::2, :]
    x2 = xv[:, 0::2, 1::2, :]
    x3 = xv[:, 1::2, 1::2, :]
    xm = jnp.concatenate([x0, x1, x2, x3], axis=-1).reshape(B, -1, 4 * C)
    mean = jnp.mean(xm, axis=-1, keepdims=True)
    var = jnp.mean((xm - mean) ** 2, axis=-1, keepdims=True)
    xn = (xm - mean) / jnp.sqrt(var + LN_EPS) * gamma + beta
    return xn @ weight.T


if __name__ == "__main__":
    # Small shapes consistent with the module: B=2, H=W=16, C=32.
    B, H, W, C = 2, 16, 16, 32
    key = jax.random.PRNGKey(0)
    kx, kg, kb, kw = jax.random.split(key, 4)

    x = jax.random.normal(kx, (B, H * W, C), dtype=jnp.float32)
    # Deterministic synthetic parameters (shapes from __init__):
    gamma = 1.0 + 0.1 * jax.random.normal(kg, (4 * C,), dtype=jnp.float32)    # norm.weight
    beta = 0.1 * jax.random.normal(kb, (4 * C,), dtype=jnp.float32)           # norm.bias
    weight = jax.random.normal(kw, (2 * C, 4 * C), dtype=jnp.float32) * 0.02  # reduction.weight

    # jit so the wrapper reshapes / parameter folding stay free (no HBM copies).
    fwd = jax.jit(functools.partial(patch_merging, input_resolution=(H, W)))
    out = jax.block_until_ready(fwd(x, gamma, beta, weight))

    ref = _reference(x, gamma, beta, weight, (H, W))
    assert out.shape == (B, (H // 2) * (W // 2), 2 * C), out.shape
    # bf16 MXU operands (f32 accumulation) + rank-1 mean folding -> loose tol.
    err = float(jnp.max(jnp.abs(out - ref)))
    assert bool(jnp.allclose(out, ref, atol=3e-2, rtol=3e-2)), \
        f"mismatch, max abs err {err}"

    print("KERNEL_OK")
</pallas_src>

<mosaic_0001>
module attributes {stable_mosaic.version = 11 : i64} {
  func.func @_patch_merge_kernel(%arg0: i32, %arg1: memref<4x1x8x64xf32, #tpu.memory_space<vmem>>, %arg2: memref<4x1x8x64xf32, #tpu.memory_space<vmem>>, %arg3: memref<64x64xbf16, #tpu.memory_space<vmem>>, %arg4: memref<64x64xbf16, #tpu.memory_space<vmem>>, %arg5: memref<1x64xf32, #tpu.memory_space<vmem>>, %arg6: memref<1x64xf32, #tpu.memory_space<vmem>>, %arg7: memref<4x8x64xf32, #tpu.memory_space<vmem>>) attributes {dimension_semantics = [#tpu.dimension_semantics<parallel>], iteration_bounds = array<i64: 4>, scalar_prefetch = 0 : i64, scratch_operands = 0 : i64, tpu.core_type = #tpu.core_type<tc>, window_params = [{transform_indices = @transform_0, window_bounds = array<i64: 4, 1, 8, 64>}, {transform_indices = @transform_1, window_bounds = array<i64: 4, 1, 8, 64>}, {pipeline_mode = #tpu.pipeline_mode<synchronous>, transform_indices = @transform_2, window_bounds = array<i64: 64, 64>}, {pipeline_mode = #tpu.pipeline_mode<synchronous>, transform_indices = @transform_3, window_bounds = array<i64: 64, 64>}, {pipeline_mode = #tpu.pipeline_mode<synchronous>, transform_indices = @transform_4, window_bounds = array<i64: 1, 64>}, {pipeline_mode = #tpu.pipeline_mode<synchronous>, transform_indices = @transform_5, window_bounds = array<i64: 1, 64>}, {transform_indices = @transform_6, window_bounds = array<i64: 4, 8, 64>}]} {
    %c0 = arith.constant 0 : index
    %c0_0 = arith.constant 0 : index
    %c0_1 = arith.constant 0 : index
    %c0_2 = arith.constant 0 : index
    %0 = vector.load %arg1[%c0, %c0_0, %c0_1, %c0_2] : memref<4x1x8x64xf32, #tpu.memory_space<vmem>>, vector<4x1x8x64xf32>
    %1 = vector.shape_cast %0 : vector<4x1x8x64xf32> to vector<4x8x64xf32>
    %2 = vector.shape_cast %1 : vector<4x8x64xf32> to vector<32x64xf32>
    %c0_3 = arith.constant 0 : index
    %c0_4 = arith.constant 0 : index
    %c0_5 = arith.constant 0 : index
    %c0_6 = arith.constant 0 : index
    %3 = vector.load %arg2[%c0_3, %c0_4, %c0_5, %c0_6] : memref<4x1x8x64xf32, #tpu.memory_space<vmem>>, vector<4x1x8x64xf32>
    %4 = vector.shape_cast %3 : vector<4x1x8x64xf32> to vector<4x8x64xf32>
    %5 = vector.shape_cast %4 : vector<4x8x64xf32> to vector<32x64xf32>
    %cst = arith.constant dense<0.000000e+00> : vector<32xf32>
    %6 = vector.multi_reduction <add>, %2, %cst [1] : vector<32x64xf32> to vector<32xf32>
    %7 = vector.shape_cast %6 : vector<32xf32> to vector<32x1xf32>
    %cst_7 = arith.constant dense<0.000000e+00> : vector<32xf32>
    %8 = vector.multi_reduction <add>, %5, %cst_7 [1] : vector<32x64xf32> to vector<32xf32>
    %9 = vector.shape_cast %8 : vector<32xf32> to vector<32x1xf32>
    %10 = arith.addf %7, %9 : vector<32x1xf32>
    %11 = arith.mulf %2, %2 : vector<32x64xf32>
    %cst_8 = arith.constant dense<0.000000e+00> : vector<32xf32>
    %12 = vector.multi_reduction <add>, %11, %cst_8 [1] : vector<32x64xf32> to vector<32xf32>
    %13 = vector.shape_cast %12 : vector<32xf32> to vector<32x1xf32>
    %14 = arith.mulf %5, %5 : vector<32x64xf32>
    %cst_9 = arith.constant dense<0.000000e+00> : vector<32xf32>
    %15 = vector.multi_reduction <add>, %14, %cst_9 [1] : vector<32x64xf32> to vector<32xf32>
    %16 = vector.shape_cast %15 : vector<32xf32> to vector<32x1xf32>
    %17 = arith.addf %13, %16 : vector<32x1xf32>
    %cst_10 = arith.constant 7.812500e-03 : f32
    %18 = vector.broadcast %cst_10 : f32 to vector<32x1xf32>
    %19 = arith.mulf %10, %18 : vector<32x1xf32>
    %cst_11 = arith.constant 7.812500e-03 : f32
    %20 = vector.broadcast %cst_11 : f32 to vector<32x1xf32>
    %21 = arith.mulf %17, %20 : vector<32x1xf32>
    %22 = arith.mulf %19, %19 : vector<32x1xf32>
    %23 = arith.subf %21, %22 : vector<32x1xf32>
    %cst_12 = arith.constant 0.000000e+00 : f32
    %24 = vector.broadcast %cst_12 : f32 to vector<32x1xf32>
    %25 = arith.maximumf %23, %24 : vector<32x1xf32>
    %cst_13 = arith.constant 9.99999974E-6 : f32
    %26 = vector.broadcast %cst_13 : f32 to vector<32x1xf32>
    %27 = arith.addf %25, %26 : vector<32x1xf32>
    %28 = math.rsqrt %27 : vector<32x1xf32>
    %29 = arith.truncf %2 : vector<32x64xf32> to vector<32x64xbf16>
    %c0_14 = arith.constant 0 : index
    %c0_15 = arith.constant 0 : index
    %30 = vector.load %arg3[%c0_14, %c0_15] : memref<64x64xbf16, #tpu.memory_space<vmem>>, vector<64x64xbf16>
    %cst_16 = arith.constant dense<0.000000e+00> : vector<32x64xf32>
    %31 = tpu.matmul %29, %30, %cst_16 {dimension_numbers = #tpu.dot_dimension_numbers<[1], [0], [0], [1], [0, 0, 1, 1], [], []>} : vector<32x64xbf16>, vector<64x64xbf16>, vector<32x64xf32> -> vector<32x64xf32>
    %32 = arith.truncf %5 : vector<32x64xf32> to vector<32x64xbf16>
    %c0_17 = arith.constant 0 : index
    %c0_18 = arith.constant 0 : index
    %33 = vector.load %arg4[%c0_17, %c0_18] : memref<64x64xbf16, #tpu.memory_space<vmem>>, vector<64x64xbf16>
    %cst_19 = arith.constant dense<0.000000e+00> : vector<32x64xf32>
    %34 = tpu.matmul %32, %33, %cst_19 {dimension_numbers = #tpu.dot_dimension_numbers<[1], [0], [0], [1], [0, 0, 1, 1], [], []>} : vector<32x64xbf16>, vector<64x64xbf16>, vector<32x64xf32> -> vector<32x64xf32>
    %35 = arith.addf %31, %34 : vector<32x64xf32>
    %c0_20 = arith.constant 0 : index
    %c0_21 = arith.constant 0 : index
    %36 = vector.load %arg5[%c0_20, %c0_21] : memref<1x64xf32, #tpu.memory_space<vmem>>, vector<1x64xf32>
    %37 = vector.broadcast %19 : vector<32x1xf32> to vector<32x64xf32>
    %38 = vector.broadcast %36 : vector<1x64xf32> to vector<32x64xf32>
    %39 = arith.mulf %37, %38 : vector<32x64xf32>
    %40 = arith.subf %35, %39 : vector<32x64xf32>
    %41 = vector.broadcast %28 : vector<32x1xf32> to vector<32x64xf32>
    %42 = arith.mulf %41, %40 : vector<32x64xf32>
    %c0_22 = arith.constant 0 : index
    %c0_23 = arith.constant 0 : index
    %43 = vector.load %arg6[%c0_22, %c0_23] : memref<1x64xf32, #tpu.memory_space<vmem>>, vector<1x64xf32>
    %44 = vector.broadcast %43 : vector<1x64xf32> to vector<32x64xf32>
    %45 = arith.addf %42, %44 : vector<32x64xf32>
    %46 = vector.shape_cast %45 : vector<32x64xf32> to vector<4x8x64xf32>
    %c0_24 = arith.constant 0 : index
    %c0_25 = arith.constant 0 : index
    %c0_26 = arith.constant 0 : index
    %47 = vector.load %arg7[%c0_24, %c0_25, %c0_26] : memref<4x8x64xf32, #tpu.memory_space<vmem>>, vector<4x8x64xf32>
    tpu.vector_store %arg7[%c0_24, %c0_25, %c0_26], %46 {strides = array<i32>} : memref<4x8x64xf32, #tpu.memory_space<vmem>>, vector<4x8x64xf32>,
    return
  }
  func.func @transform_0(%arg0: i32) -> (i32, i32, i32, i32) {
    %c0_i32 = arith.constant 0 : i32
    %c0_i32_0 = arith.constant 0 : i32
    %c0_i32_1 = arith.constant 0 : i32
    %c0_i32_2 = arith.constant 0 : i32
    return %arg0, %c0_i32, %c0_i32_0, %c0_i32_1 : i32, i32, i32, i32
  }
  func.func @transform_1(%arg0: i32) -> (i32, i32, i32, i32) {
    %c1_i32 = arith.constant 1 : i32
    %c0_i32 = arith.constant 0 : i32
    %c0_i32_0 = arith.constant 0 : i32
    %c0_i32_1 = arith.constant 0 : i32
    return %arg0, %c1_i32, %c0_i32, %c0_i32_0 : i32, i32, i32, i32
  }
  func.func @transform_2(%arg0: i32) -> (i32, i32) {
    %c0_i32 = arith.constant 0 : i32
    %c0_i32_0 = arith.constant 0 : i32
    %c0_i32_1 = arith.constant 0 : i32
    return %c0_i32, %c0_i32_0 : i32, i32
  }
  func.func @transform_3(%arg0: i32) -> (i32, i32) {
    %c0_i32 = arith.constant 0 : i32
    %c0_i32_0 = arith.constant 0 : i32
    %c0_i32_1 = arith.constant 0 : i32
    return %c0_i32, %c0_i32_0 : i32, i32
  }
  func.func @transform_4(%arg0: i32) -> (i32, i32) {
    %c0_i32 = arith.constant 0 : i32
    %c0_i32_0 = arith.constant 0 : i32
    %c0_i32_1 = arith.constant 0 : i32
    return %c0_i32, %c0_i32_0 : i32, i32
  }
  func.func @transform_5(%arg0: i32) -> (i32, i32) {
    %c0_i32 = arith.constant 0 : i32
    %c0_i32_0 = arith.constant 0 : i32
    %c0_i32_1 = arith.constant 0 : i32
    return %c0_i32, %c0_i32_0 : i32, i32
  }
  func.func @transform_6(%arg0: i32) -> (i32, i32, i32) {
    %c0_i32 = arith.constant 0 : i32
    %c0_i32_0 = arith.constant 0 : i32
    %c0_i32_1 = arith.constant 0 : i32
    return %arg0, %c0_i32, %c0_i32_0 : i32, i32, i32
  }
}

</mosaic_0001>

<bundles_post_ra>
// kernel: patch_merging.1
= control target key start
LH: loop header
LB: loop body
LE: loop exit
PB: predicated region body
PF: predicated region fallthrough
CT: control target
= control target key end

     0   :  { %11 = vsyncpa [#allocation5], 0  ;;  %s1172_s0 = inlined_call_operand.vmem [shape: f32[16,2,8,64], index: 0, kind: input, shape index: {}, may-alias: {0,1}]   ;;  %s1173_s1 = inlined_call_operand.vmem [shape: f32[16,2,8,64], index: 1, kind: input, shape index: {}, may-alias: {0,1}]   ;;  %s1174_s2 = inlined_call_operand.vmem [shape: bf16[64,64], index: 2, kind: input, shape index: {}]   ;;  %s1175_s3 = inlined_call_operand.vmem [shape: bf16[64,64], index: 3, kind: input, shape index: {}]   ;;  %s1176_s4 = inlined_call_operand.vmem [shape: f32[1,64], index: 4, kind: input, shape index: {}]   ;;  %s1177_s5 = inlined_call_operand.vmem [shape: f32[1,64], index: 5, kind: input, shape index: {}]   ;;  %s1178_s6 = inlined_call_operand.hbm [shape: f32[16,8,64], index: 6, kind: output, shape index: {}]  }
   0x1   :  { %13 = vsyncpa [#allocation5 + $0x1], 0  ;;  %s991_s21 = smov 0   ;;  %s993_s22 = smov 0  }
   0x2   :  { %s995_s23 = smov 0   ;;  %s997_s24 = smov 0  }
   0x3 LB: > { %s759_s25 = sadd.s32 4294967295, %s952_s24   ;;  %s760_s26 = sadd.s32 4294967294, %s952_s24   ;;  %s952_s24 = sphi %s997_s24, %s1185_s24   ;;  %s948_s23 = sphi %s995_s23, %s1184_s23   ;;  %s944_s22 = sphi %s993_s22, %s1183_s22   ;;  %s940_s21 = sphi %s991_s21, %s1182_s21  }
   0x4   : > { %s1014_s27 = sadd.s32 1, %s952_s24   ;;  %s26_s28 = sadd.s32 1, %s948_s23 }
   0x5   : > { %s23_s29 = ssub.s32 %s952_s24, %s1014_s27  ;;  %p33_p0 = scmp.ne.s32.totalorder %s948_s23, %s944_s22 }
   0x6   : > { %p24_p1 = scmp.eq.s32.totalorder %s23_s29, 0  ;;  %p34_p2 = scmp.eq.s32.totalorder %s952_s24, 0 }
   0x7   : > { %p173_p3 = scmp.eq.s32.totalorder %s759_s25, 3  ;;  %p178_p4 = scmp.ne.s32.totalorder %s944_s22, %s940_s21 }
   0x8   : > { %s1027_s30 = scalar_select %p24_p1, %s948_s23, %s26_s28  }
   0x9   : > { %p1029_p5 = por %p34_p2, %p33_p0  ;;  %p1033_p6 = por %p173_p3, %p33_p0 }
   0xa   : > { %p179_p7 = scmp.eq.s32.totalorder %s760_s26, 3  ;;  %p762_p9 = scmp.ge.s32.totalorder %s952_s24, 4 }
   0xc   : > { %p1037_p8 = por %p179_p7, %p178_p4  ;;  %207 = sbr.rel (%p762_p9) target bundleno = 33 (0x21), region = 32 }
  0x11   : > { %210 = sbr.rel (!%p1029_p5) target bundleno = 25 (0x19), region = 36  ;;  %s212_s10 = sand.u32 (%p1029_p5), 1, %s948_s23  }
  0x12   : > { %s820_s11 = sshll.u32 (%p1029_p5), %s952_s24, 6  ;;  %s763_s12 = sshll.u32 (%p1029_p5), %s212_s10, 5 }
  0x13   : > { %s218_s15 = scalar_lea.vmem (%p1029_p5), %s1172_s0, %s820_s11  ;;  %s214_s16 = scalar_lea.vmem (%p1029_p5), [#allocation2], %s763_s12 }
  0x14   : > { %v253_v0 = vld [vmem:[%s218_s15] sm:$0xff] (%p1029_p5)  ;;  %v255_v1 = vld [vmem:[%s218_s15 + $0x10] sm:$0xff] (%p1029_p5) }
  0x15   : > { %v257_v2 = vld [vmem:[%s218_s15 + $0x20] sm:$0xff] (%p1029_p5)  ;;  %254 = vst [vmem:[%s214_s16] sm:$0xff] (%p1029_p5), %v253_v0  ;;  %v259_v3 = vld [vmem:[%s218_s15 + $0x30] sm:$0xff] (%p1029_p5) }
  0x16   : > { %256 = vst [vmem:[%s214_s16 + $0x8] sm:$0xff] %v255_v1 }
  0x17   : > { %258 = vst [vmem:[%s214_s16 + $0x10] sm:$0xff] %v257_v2 }
  0x18   : > { %260 = vst [vmem:[%s214_s16 + $0x18] sm:$0xff] %v259_v3 }
  0x19 PF: > { %266 = sbr.rel (!%p1029_p5) target bundleno = 33 (0x21), region = 74  ;;  %s268_s17 = sand.u32 (%p1029_p5), 1, %s948_s23  }
  0x1a   : > { %s821_s18 = sshll.u32 (%p1029_p5), %s952_s24, 6  ;;  %s767_s19 = sshll.u32 (%p1029_p5), %s268_s17, 5 }
  0x1b   : > { %s704_s28 = scalar_lea.vmem (%p1029_p5), %s1173_s1, %s821_s18  ;;  %s270_s29 = scalar_lea.vmem (%p1029_p5), [#allocation3], %s767_s19 }
  0x1c   : > { %v770_v4 = vld [vmem:[%s704_s28 + $0x8] sm:$0xff] (%p1029_p5)  ;;  %v771_v5 = vld [vmem:[%s704_s28 + $0x18] sm:$0xff] (%p1029_p5) }
  0x1d   : > { %v772_v6 = vld [vmem:[%s704_s28 + $0x28] sm:$0xff] (%p1029_p5)  ;;  %311 = vst [vmem:[%s270_s29] sm:$0xff] (%p1029_p5), %v770_v4  ;;  %v773_v7 = vld [vmem:[%s704_s28 + $0x38] sm:$0xff] (%p1029_p5) }
  0x1e   : > { %313 = vst [vmem:[%s270_s29 + $0x8] sm:$0xff] %v771_v5 }
  0x1f   : > { %315 = vst [vmem:[%s270_s29 + $0x10] sm:$0xff] %v772_v6 }
  0x20   : > { %317 = vst [vmem:[%s270_s29 + $0x18] sm:$0xff] %v773_v7 }
  0x21 PF: > { %p774_p10 = scmp.ge.s32.totalorder %s952_s24, 1  ;;  %p322_p11 = scmp.lt.s32.totalorder %s952_s24, 5 }
  0x23   : > { %p323_p12 = pnand %p774_p10, %p322_p11 }
  0x24   : > { %s329_s13 = sand.u32 (!%p323_p12), 1, %s944_s22   ;;  %s830_s20 = sshll.u32 (!%p323_p12), %s759_s25, 5 }
  0x25   : > { %326 = sbr.rel (%p323_p12) target bundleno = 238 (0xee), region = 112  ;;  %s1067_s14 = sshll.u32 (!%p323_p12), %s329_s13, 5 }
  0x26   : > { %s338_s15 = scalar_lea.vmem (!%p323_p12), [#allocation3], %s1067_s14  ;;  %s331_s18 = scalar_lea.vmem (!%p323_p12), [#allocation2], %s1067_s14 }
  0x27   : > { %s368_s26 = scalar_lea.vmem (!%p323_p12), [#allocation4], %s1067_s14  ;;  %s668_s7 = scalar_lea.hbm (!%p323_p12), %s1178_s6, %s830_s20 }
  0x28   : > { %s669_s25 = sshll.u32 (!%p323_p12), %s368_s26, 4  ;;  %s671_s14 = sshll.u32 (!%p323_p12), %s668_s7, 4  ;;  %s670_s25 = int_to_ptr.vmem [resolvable:$true] %s669_s25  ;;  %s672_s14 = int_to_ptr.hbm [resolvable:$true] %s671_s14 }
  0x29   : > { %s657_s10 = scalar_lea.sflag (!%p323_p12), [#allocation5], %s329_s13  ;;  %s904_s11 = sshra.s32 (!%p323_p12), %s672_s14, 4  ;;  %s905_s11 = int_to_ptr.hbm [resolvable:$true] %s904_s11 }
  0x2a   : > { %v829_v8 = vld [vmem:[%s1175_s3 + $0x18] sm:$0xff]  ;;  %vm381_vm0 = vcmask 523264   ;;  %v1070_v10 = vld [vmem:[%s338_s15] sm:$0xff]  ;;  %v828_v11 = vld [vmem:[%s1175_s3 + $0x10] sm:$0xff]  ;;  %s906_s12 = scalar_lea.hbm %s905_s11, 32  ;;  %s910_s17 = scalar_lea.hbm %s1178_s6, 128 }
  0x2b   : > { %v825_v9 = vld [vmem:[%s1174_s2 + $0x18] sm:$0xff]  ;;  %564 = vmatpush.bf16.msra.mxu0 %v829_v8  ;;  %831 = vmatpush.bf16.msra.mxu2 %v829_v8  ;;  %v394_v12 = vsel %vm381_vm0, %v1070_v10, 0.0  ;;  %v375_v13 = vld [vmem:[%s331_s18 + $0x10] sm:$0xff]  ;;  %v373_v14 = vld [vmem:[%s331_s18] sm:$0xff]  ;;  %v426_v46 = vmul.f32 %v1070_v10, %v1070_v10  ;;  %p907_p13 = scmp.ne.s32.totalorder %s905_s11, %s906_s12  ;;  %p911_p2 = scmp.lt.s32.totalorder %s905_s11, %s1178_s6 }
  0x2c   : > { %613 = vmatpush.bf16.msra.mxu1 %v825_v9  ;;  %835 = vmatpush.bf16.msra.mxu3 %v825_v9  ;;  %v824_v15 = vld [vmem:[%s1174_s2 + $0x10] sm:$0xff]  ;;  %v388_v16 = vsel %vm381_vm0, %v375_v13, 0.0  ;;  %v382_v17 = vsel %vm381_vm0, %v373_v14, 0.0  ;;  %v827_v18 = vld [vmem:[%s1175_s3 + $0x8] sm:$0xff]  ;;  %v376_v21 = vld [vmem:[%s331_s18 + $0x18] sm:$0xff]  ;;  %v410_v32 = vmul.f32 %v373_v14, %v373_v14  ;;  %v412_v39 = vmul.f32 %v375_v13, %v375_v13  ;;  %p912_p3 = scmp.lt.s32.totalorder %s910_s17, %s906_s12 }
  0x2d   : > { %395 = vadd.xlane.f32.xlu2 %v394_v12  ;;  %389 = vadd.xlane.f32.xlu1 %v388_v16  ;;  %v378_v19 = vld [vmem:[%s338_s15 + $0x8] sm:$0xff]  ;;  %v391_v24 = vsel %vm381_vm0, %v376_v21, 0.0  ;;  %v826_v26 = vld [vmem:[%s1175_s3] sm:$0xff]  ;;  %v379_v27 = vld [vmem:[%s338_s15 + $0x10] sm:$0xff]  ;;  %v511_v34 = vpack.c.bf16 %v376_v21, %v375_v13  ;;  %v413_v38 = vmul.f32 %v376_v21, %v376_v21  ;;  %v430_v49 = vsel %vm381_vm0, %v426_v46, 0.0  ;;  %p908_p0 = pnand %p907_p13, %p1033_p6 }
  0x2e   : > { %383 = vadd.xlane.f32.xlu0 %v382_v17  ;;  %v823_v20 = vld [vmem:[%s1174_s2 + $0x8] sm:$0xff]  ;;  %v397_v23 = vsel %vm381_vm0, %v378_v19, 0.0  ;;  %v380_v28 = vld [vmem:[%s338_s15 + $0x18] sm:$0xff]  ;;  %v822_v29 = vld [vmem:[%s1174_s2] sm:$0xff]  ;;  %v520_v30 = vpack.c.bf16 %v378_v19, %v1070_v10  ;;  %v414_v35 = vsel %vm381_vm0, %v410_v32, 0.0  ;;  %v400_v37 = vsel %vm381_vm0, %v379_v27, 0.0  ;;  %p913_p4 = por %p912_p3, %p911_p2 }
  0x2f   : > { %565 = vmatpush.bf16.msra.mxu0 %v828_v11  ;;  %832 = vmatpush.bf16.msra.mxu2 %v828_v11  ;;  %v374_v22 = vld [vmem:[%s331_s18 + $0x8] sm:$0xff]  ;;  %v521_v31 = vpack.c.bf16 %v380_v28, %v379_v27  ;;  %v403_v36 = vsel %vm381_vm0, %v380_v28, 0.0  ;;  %v423_v41 = vsel %vm381_vm0, %v413_v38, 0.0  ;;  %v420_v42 = vsel %vm381_vm0, %v412_v39, 0.0  ;;  %p909_p1 = pneg %p908_p0 }
  0x30   : > { %614 = vmatpush.bf16.msra.mxu1 %v824_v15  ;;  %836 = vmatpush.bf16.msra.mxu3 %v824_v15  ;;  %v385_v25 = vsel %vm381_vm0, %v374_v22, 0.0  ;;  %v510_v33 = vpack.c.bf16 %v374_v22, %v373_v14  ;;  %v411_v40 = vmul.f32 %v374_v22, %v374_v22  ;;  %v428_v44 = vmul.f32 %v379_v27, %v379_v27 }
  0x31   : > { %v427_v45 = vmul.f32 %v378_v19, %v378_v19  ;;  %v429_v50 = vmul.f32 %v380_v28, %v380_v28  ;;  %p914_p5 = pnand %p913_p4, %p909_p1 }
  0x32   : > { %v417_v43 = vsel %vm381_vm0, %v411_v40, 0.0  ;;  %v436_v47 = vsel %vm381_vm0, %v428_v44, 0.0 }
  0x33   : > { %566 = vmatpush.bf16.msra.mxu0 %v827_v18  ;;  %833 = vmatpush.bf16.msra.mxu2 %v827_v18  ;;  %v433_v48 = vsel %vm381_vm0, %v427_v45, 0.0  ;;  %v439_v51 = vsel %vm381_vm0, %v429_v50, 0.0 }
  0x34   : > { %615 = vmatpush.bf16.msra.mxu1 %v823_v20  ;;  %837 = vmatpush.bf16.msra.mxu3 %v823_v20 }
  0x35   : > { %398 = vadd.xlane.f32.xlu2 %v397_v23  ;;  %392 = vadd.xlane.f32.xlu1 %v391_v24 }
  0x36   : > { %386 = vadd.xlane.f32.xlu0 %v385_v25 }
  0x37   : > { %567 = vmatpush.bf16.msra.mxu0 %v826_v26  ;;  %834 = vmatpush.bf16.msra.mxu2 %v826_v26 }
  0x38   : > { %616 = vmatpush.bf16.msra.mxu1 %v822_v29  ;;  %838 = vmatpush.bf16.msra.mxu3 %v822_v29 }
  0x3a   : > { %794 = vmatmul.msk.bf16.vlgmr.msra.gmra.mxu0 %vm381_vm0, %v520_v30  ;;  %795 = vmatmul.msk.bf16.vlgmr.msra.gmra.mxu2 %vm381_vm0, %v521_v31 }
  0x3b   : > { %812 = vmatmul.msk.bf16.vlgmr.msra.gmra.mxu1 %vm381_vm0, %v510_v33  ;;  %813 = vmatmul.msk.bf16.vlgmr.msra.gmra.mxu3 %vm381_vm0, %v511_v34 }
  0x3d   : > { %415 = vadd.xlane.f32.xlu2 %v414_v35  ;;  %404 = vadd.xlane.f32.xlu1 %v403_v36 }
  0x3e   : > { %401 = vadd.xlane.f32.xlu0 %v400_v37 }
  0x45   : > { %424 = vadd.xlane.f32.xlu2 %v423_v41  ;;  %421 = vadd.xlane.f32.xlu1 %v420_v42  ;;  %v880_v42 = vld [vmem:[%s1176_s4] ss:$0 sm:$0xff] }
  0x46   : > { %418 = vadd.xlane.f32.xlu0 %v417_v43 }
  0x4d   : > { %437 = vadd.xlane.f32.xlu2 %v436_v47  ;;  %434 = vadd.xlane.f32.xlu1 %v433_v48 }
  0x4e   : > { %431 = vadd.xlane.f32.xlu0 %v430_v49 }
  0x56   : > { %440 = vadd.xlane.f32.xlu0 %v439_v51 }
  0xa0   : > { %v396_v52 = vpop.xlane.xlu2 %395  ;;  %v390_v53 = vpop.xlane.xlu1 %389 }
  0xa1   : > { %v384_v54 = vpop.xlane.xlu0 %383 }
  0xa2   : > { %v406_v0 = vadd.f32 %v396_v52, %v384_v54 }
  0xa4   : > { %v446_v3 = vmul.f32 0.0078125, %v406_v0 }
  0xa6   : > { %v454_v12 = vmul.f32 %v446_v3, %v446_v3 }
  0xa8   : > { %v399_v55 = vpop.xlane.xlu2 %398  ;;  %v393_v56 = vpop.xlane.xlu1 %392 }
  0xa9   : > { %v387_v57 = vpop.xlane.xlu0 %386 }
  0xaa   : > { %v407_v2 = vadd.f32 %v399_v55, %v387_v57 }
  0xac   : > { %v447_v5 = vmul.f32 0.0078125, %v407_v2 }
  0xae   : > { %v455_v15 = vmul.f32 %v447_v5, %v447_v5  ;;  %v633_v54 = vmul.f32 %v880_v42, %v447_v5 }
  0xb0   : > { %v416_v58 = vpop.xlane.xlu2 %415  ;;  %v405_v59 = vpop.xlane.xlu1 %404 }
  0xb1   : > { %v402_v60 = vpop.xlane.xlu0 %401  ;;  %v409_v16 = vadd.f32 %v405_v59, %v393_v56 }
  0xb2   : > { %v408_v1 = vadd.f32 %v402_v60, %v390_v53  ;;  %v632_v53 = vmul.f32 %v880_v42, %v446_v3  ;;  %v881_v3 = vld [vmem:[%s1177_s5] ss:$0 sm:$0xff] }
  0xb3   : > { %v1115_v23 = vmul.f32 0.0078125, %v409_v16 }
  0xb4   : > { %v448_v4 = vmul.f32 0.0078125, %v408_v1 }
  0xb5   : > { %v457_v33 = vmul.f32 %v1115_v23, %v1115_v23 }
  0xb6   : > { %v456_v13 = vmul.f32 %v448_v4, %v448_v4  ;;  %v634_v60 = vmul.f32 %v880_v42, %v448_v4 }
  0xb7   : > { %v569_v31 = vpop.f32.mrf.mxu0 }
  0xb8   : > { %v425_v61 = vpop.xlane.xlu2 %424  ;;  %v422_v62 = vpop.xlane.xlu1 %421 }
  0xb9   : > { %v419_v63 = vpop.xlane.xlu0 %418  ;;  %v618_v32 = vpop.f32.mrf.mxu1 }
  0xbd   : > { %v574_v43 = vpop.f32.mrf.mxu2 }
  0xbe   : > { %v623_v44 = vpop.f32.mrf.mxu3 }
  0xbf   : > { %v571_v48 = vpop.f32.mrf.mxu0  ;;  %v624_v55 = vadd.f32 %v623_v44, %v574_v43 }
  0xc0   : > { %v438_v6 = vpop.xlane.xlu2 %437  ;;  %v435_v7 = vpop.xlane.xlu1 %434 }
  0xc1   : > { %v444_v8 = vadd.f32 %v438_v6, %v422_v62  ;;  %v432_v9 = vpop.xlane.xlu0 %431  ;;  %v443_v10 = vadd.f32 %v435_v7, %v419_v63  ;;  %v620_v49 = vpop.f32.mrf.mxu1  ;;  %v638_v2 = vsub.f32 %v624_v55, %v634_v60 }
  0xc2   : > { %v442_v11 = vadd.f32 %v432_v9, %v416_v58  ;;  %v621_v57 = vadd.f32 %v620_v49, %v571_v48 }
  0xc3   : > { %v452_v14 = vmul.f32 0.0078125, %v444_v8  ;;  %v451_v17 = vmul.f32 0.0078125, %v443_v10 }
  0xc4   : > { %v450_v18 = vmul.f32 0.0078125, %v442_v11  ;;  %v637_v4 = vsub.f32 %v621_v57, %v633_v54 }
  0xc5   : > { %v460_v19 = vsub.f32 %v452_v14, %v456_v13  ;;  %v459_v20 = vsub.f32 %v451_v17, %v455_v15 }
  0xc6   : > { %v458_v21 = vsub.f32 %v450_v18, %v454_v12  ;;  %v576_v12 = vpop.f32.mrf.mxu2  ;;  %v625_v13 = vpop.f32.mrf.mxu3 }
  0xc7   : > { %v464_v22 = vmax.f32 %v460_v19, 0.0  ;;  %v463_v24 = vmax.f32 %v459_v20, 0.0 }
  0xc8   : > { %v462_v25 = vmax.f32 %v458_v21, 0.0  ;;  %v626_v21 = vadd.f32 %v625_v13, %v576_v12 }
  0xc9   : > { %v468_v26 = vadd.f32 1e-05, %v464_v22  ;;  %v441_v27 = vpop.xlane.xlu0 %440  ;;  %v467_v28 = vadd.f32 1e-05, %v463_v24 }
  0xca   : > { %v466_v29 = vadd.f32 1e-05, %v462_v25  ;;  %v445_v30 = vadd.f32 %v441_v27, %v425_v61  ;;  %v619_v61 = vadd.f32 %v618_v32, %v569_v31  ;;  %v635_v25 = vmul.f32 %v880_v42, %v1115_v23 }
  0xcb   : > { %882 = vrsqrt.f32 %v468_v26  ;;  %vm496_vm3 = vweird.f32 %v468_v26  ;;  %vm486_vm5 = vweird.f32 %v467_v28 }
  0xcc   : > { %884 = vrsqrt.f32 %v467_v28  ;;  %v453_v34 = vmul.f32 0.0078125, %v445_v30  ;;  %vm476_vm8 = vweird.f32 %v466_v29  ;;  %v636_v9 = vsub.f32 %v619_v61, %v632_v53 }
  0xcd   : > { %886 = vrsqrt.f32 %v466_v29  ;;  %v639_v27 = vsub.f32 %v626_v21, %v635_v25 }
  0xce   : > { %v461_v35 = vsub.f32 %v453_v34, %v457_v33 }
  0xd0   : > { %v465_v36 = vmax.f32 %v461_v35, 0.0 }
  0xd1   : > { %v883_v37 = vpop.eup %882 }
  0xd2   : > { %v885_v38 = vpop.eup %884  ;;  %v491_v39 = vmul.f32 %v883_v37, %v468_v26  ;;  %v1119_v40 = vadd.f32 1e-05, %v465_v36  ;;  %vm497_vm1 = vweird.f32 %v883_v37 }
  0xd3   : > { %v887_v41 = vpop.eup %886  ;;  %v481_v45 = vmul.f32 %v885_v38, %v467_v28  ;;  %vm487_vm2 = vweird.f32 %v885_v38  ;;  %vm498_vm6 = vmor %vm496_vm3, %vm497_vm1 }
  0xd4   : > { %v492_v46 = vmul.f32 %v883_v37, %v491_v39  ;;  %v471_v47 = vmul.f32 %v887_v41, %v466_v29  ;;  %888 = vrsqrt.f32 %v1119_v40  ;;  %vm477_vm4 = vweird.f32 %v887_v41  ;;  %vm488_vm7 = vmor %vm486_vm5, %vm487_vm2 }
  0xd5   : > { %v482_v50 = vmul.f32 %v885_v38, %v481_v45  ;;  %vm478_vm9 = vmor %vm476_vm8, %vm477_vm4  ;;  %vm506_vm11 = vweird.f32 %v1119_v40 }
  0xd6   : > { %v493_v51 = vmul.f32 0.5, %v492_v46  ;;  %v472_v52 = vmul.f32 %v887_v41, %v471_v47 }
  0xd7   : > { %v483_v56 = vmul.f32 0.5, %v482_v50 }
  0xd8   : > { %v494_v58 = vsub.f32 1.5, %v493_v51  ;;  %v473_v59 = vmul.f32 0.5, %v472_v52 }
  0xd9   : > { %v484_v62 = vsub.f32 1.5, %v483_v56 }
  0xda   : > { %v889_v63 = vpop.eup %888  ;;  %v495_v0 = vmul.f32 %v883_v37, %v494_v58  ;;  %v474_v1 = vsub.f32 1.5, %v473_v59 }
  0xdb   : > { %v485_v5 = vmul.f32 %v885_v38, %v484_v62  ;;  %v501_v6 = vmul.f32 %v889_v63, %v1119_v40  ;;  %vm507_vm10 = vweird.f32 %v889_v63 }
  0xdc   : > { %v499_v7 = vsel %vm498_vm6, %v883_v37, %v495_v0  ;;  %v475_v8 = vmul.f32 %v887_v41, %v474_v1  ;;  %vm508_vm12 = vmor %vm506_vm11, %vm507_vm10 }
  0xdd   : > { %v489_v10 = vsel %vm488_vm7, %v885_v38, %v485_v5  ;;  %v642_v11 = vmul.f32 %v638_v2, %v499_v7  ;;  %v502_v14 = vmul.f32 %v889_v63, %v501_v6 }
  0xde   : > { %v641_v15 = vmul.f32 %v637_v4, %v489_v10  ;;  %v479_v16 = vsel %vm478_vm9, %v887_v41, %v475_v8 }
  0xdf   : > { %v650_v17 = vadd.f32 %v881_v3, %v642_v11  ;;  %v640_v18 = vmul.f32 %v636_v9, %v479_v16  ;;  %v503_v19 = vmul.f32 0.5, %v502_v14 }
  0xe0   : > { %v649_v20 = vadd.f32 %v881_v3, %v641_v15 }
  0xe1   : > { %654 = vst.msk [vmem:[%s368_s26 + $0x10] sm:$0xff] %vm381_vm0, %v650_v17  ;;  %v648_v22 = vadd.f32 %v881_v3, %v640_v18  ;;  %v504_v24 = vsub.f32 1.5, %v503_v19 }
  0xe2   : > { %653 = vst.msk [vmem:[%s368_s26 + $0x8] sm:$0xff] %vm381_vm0, %v649_v20 }
  0xe3   : > { %652 = vst.msk [vmem:[%s368_s26] sm:$0xff] %vm381_vm0, %v648_v22  ;;  %v505_v26 = vmul.f32 %v889_v63, %v504_v24 }
  0xe5   : > { %v509_v28 = vsel %vm508_vm12, %v889_v63, %v505_v26 }
  0xe6   : > { %v643_v29 = vmul.f32 %v639_v27, %v509_v28 }
  0xe8   : > { %v651_v23 = vadd.f32 %v881_v3, %v643_v29 }
  0xea   : > { %655 = vst.msk [vmem:[%s368_s26 + $0x18] sm:$0xff] %vm381_vm0, %v651_v23 }
  0xeb   : > { %917 = shalt.err (!%p914_p5)
}
  0xec   : > { %s954_s13 = smov 128   ;;  %s955_s20 = smov 8  }
  0xed   : > { %839 = dma.vmem_to_hbm [thread:$0]  (%p1033_p6), %s670_s25, 512, %s672_s14, %s657_s10, %s954_s13, %s954_s13, %s955_s20  }
  0xee PF: > { %p845_p7 = scmp.ge.s32.totalorder %s952_s24, 2  ;;  %s686_s26 = sand.u32 1, %s940_s21  }
  0xef   : > { %s687_s28 = scalar_lea.sflag [#allocation5], %s686_s26 }
  0xf0   : > { %p842_p9 = pnand %p845_p7, %p1037_p8 }
  0xf2   : > { %p843_p10 = pneg %p842_p9 }
  0xf4   : > { %935 = dma.done.wait (%p843_p10), %s687_s28, 512  }
  0xf5   : > { %937 = vsyncadd (%p843_p10), %s687_s28, 4294966784  ;;  %p16_p11 = scmp.ge.s32.totalorder %s1014_s27, 6   ;;  %s1182_s21 = smov %s944_s22 }
  0xf6   : > { %s1183_s22 = smov %s948_s23  ;;  %s1184_s23 = smov %s1027_s30 }
  0xf7   : > { %s1185_s24 = smov %s1014_s27  ;;  %18 = sbr.rel (!%p16_p11) target bundleno = 3 (0x3), region = 168 }
  0xfc   :  { %693 = vsyncpa [#allocation5], 1 }
  0xfd   :  { %695 = vsyncpa [#allocation5 + $0x1], 1 }

</bundles_post_ra>
